<compile_context>
chip_gen: v5e
topology: v5e:2x2
jax: 0.10.0
libtpu: 0.0.40
codegen_flags: <defaults>
</compile_context>

<pallas_src>
import math
from typing import NamedTuple

import jax
import jax.numpy as jnp
from jax.experimental import pallas as pl
from jax.experimental.pallas import tpu as pltpu


# ----------------------------------------------------------------------------- kernels


def _ffn_kernel_single(x_ref, w1_ref, b1_ref, w2_ref, b2_ref, o_ref):
    """H fits in a single tile: no reduction axis, no accumulator bookkeeping."""
    h = jnp.dot(x_ref[...], w1_ref[...], preferred_element_type=jnp.float32)
    h = jnp.maximum(h + b1_ref[...], 0.0)
    y = jnp.dot(h.astype(w2_ref.dtype), w2_ref[...],
                preferred_element_type=jnp.float32)
    o_ref[...] = (y + b2_ref[...]).astype(o_ref.dtype)


def _ffn_kernel_htiled_f32out(x_ref, w1_ref, b1_ref, w2_ref, b2_ref, o_ref):
    """H tiled on grid axis 1; f32 output -> accumulate directly into o_ref."""
    h_idx = pl.program_id(1)
    h = jnp.dot(x_ref[...], w1_ref[...], preferred_element_type=jnp.float32)
    h = jnp.maximum(h + b1_ref[...], 0.0)
    part = jnp.dot(h.astype(w2_ref.dtype), w2_ref[...],
                   preferred_element_type=jnp.float32)

    @pl.when(h_idx == 0)
    def _first():
        o_ref[...] = part + b2_ref[...]          # b2 folded into init

    @pl.when(h_idx != 0)
    def _rest():
        o_ref[...] += part


def _ffn_kernel_htiled_acc(x_ref, w1_ref, b1_ref, w2_ref, b2_ref, o_ref, acc_ref):
    """H tiled on grid axis 1; non-f32 output -> f32 VMEM accumulator."""
    h_idx = pl.program_id(1)
    h = jnp.dot(x_ref[...], w1_ref[...], preferred_element_type=jnp.float32)
    h = jnp.maximum(h + b1_ref[...], 0.0)
    part = jnp.dot(h.astype(w2_ref.dtype), w2_ref[...],
                   preferred_element_type=jnp.float32)

    @pl.when(h_idx == 0)
    def _first():
        acc_ref[...] = part + b2_ref[...]        # b2 folded into init

    @pl.when(h_idx != 0)
    def _rest():
        acc_ref[...] += part

    @pl.when(h_idx == pl.num_programs(1) - 1)
    def _finalize():
        o_ref[...] = acc_ref[...].astype(o_ref.dtype)


# ----------------------------------------------------------------------------- wrapper


def _round_up(x, m):
    return (x + m - 1) // m * m


def _tpu_config():
    """Generation-aware tile defaults and VMEM caps."""
    kind = ""
    try:
        kind = jax.devices()[0].device_kind.lower()
    except Exception:
        pass
    if "v7" in kind:
        # 64 MiB VMEM per TensorCore, 2 TCs, high HBM BW -> tm=512 is MXU-bound.
        return dict(vmem_limit=52 * 1024 * 1024, num_tc=2, tm=512, th=256)
    if "v6" in kind:
        # MXU:HBM ratio ~ 570-650 flop/B -> need tm~1024 to stay MXU-bound.
        return dict(vmem_limit=100 * 1024 * 1024, num_tc=1, tm=1024, th=256)
    if "v5" in kind:
        return dict(vmem_limit=100 * 1024 * 1024, num_tc=1, tm=512, th=256)
    return dict(vmem_limit=64 * 1024 * 1024, num_tc=1, tm=512, th=256)


class FFNParams(NamedTuple):
    w1: jax.Array   # (d_in_p, H_p)  compute_dtype
    b1: jax.Array   # (1, H_p)       float32
    w2: jax.Array   # (H_p, d_out_p) compute_dtype
    b2: jax.Array   # (1, d_out_p)   float32
    d_in: int
    d_out: int
    th: int         # hidden tile; divides H_p


def prepare_ffn_params(w1, b1, w2, b2, *, compute_dtype=jnp.bfloat16, th=None):
    """Cast + zero-pad parameters ONCE (hoisted out of the per-call path).

    Zero padding of d_in / H / d_out is mathematically exact for this FFN.
    """
    d_in, H = w1.shape
    d_out = w2.shape[1]
    if th is None:
        th = _tpu_config()["th"]
    assert th % 128 == 0

    d_in_p = _round_up(d_in, 128)
    d_out_p = _round_up(d_out, 128)
    H_p = _round_up(H, 128)
    if H_p <= th:
        th = H_p
    else:
        H_p = _round_up(H_p, th)

    def pad2(a, r, c):
        if a.shape == (r, c):
            return a
        return jnp.pad(a, ((0, r - a.shape[0]), (0, c - a.shape[1])))

    w1_p = pad2(w1.astype(compute_dtype), d_in_p, H_p)
    w2_p = pad2(w2.astype(compute_dtype), H_p, d_out_p)
    b1_p = pad2(b1.astype(jnp.float32).reshape(1, -1), 1, H_p)
    b2_p = pad2(b2.astype(jnp.float32).reshape(1, -1), 1, d_out_p)
    return FFNParams(w1_p, b1_p, w2_p, b2_p, d_in, d_out, th)


def position_wise_ffn(x, params: FFNParams, *, tm=None):
    """x: (..., d_in) -> (..., d_out) using pre-prepared (padded, cast) params."""
    cfg = _tpu_config()
    lead = x.shape[:-1]
    d_in = x.shape[-1]
    assert d_in == params.d_in, f"d_in mismatch: {d_in} vs {params.d_in}"
    M = math.prod(lead) if lead else 1
    out_dtype = x.dtype
    compute_dtype = params.w1.dtype

    d_in_p, H_p = params.w1.shape
    d_out_p = params.w2.shape[1]
    d_out = params.d_out
    th = params.th

    # ---- row tile selection --------------------------------------------------
    if tm is None:
        tm = cfg["tm"]
    tm = max(16, _round_up(tm, 16))
    M_p = _round_up(M, 16)               # pad rows only to sublane granularity
    tm = min(tm, M_p)

    # v7x: make sure the 'parallel' row axis has >=2 blocks so both TCs work.
    if cfg["num_tc"] >= 2 and M_p >= 32 and pl.cdiv(M_p, tm) < 2:
        tm = _round_up(pl.cdiv(M_p, 2), 16)

    single_h = (H_p == th)
    use_scratch = (not single_h) and (out_dtype != jnp.float32)
    out_bytes = jnp.dtype(out_dtype).itemsize
    cdt_bytes = jnp.dtype(compute_dtype).itemsize
    vmem_limit = cfg["vmem_limit"]

    def _budget(tm_):
        b = 2 * tm_ * d_in_p * cdt_bytes            # X double-buffer
        b += 2 * d_in_p * th * cdt_bytes            # W1 double-buffer
        b += 2 * th * d_out_p * cdt_bytes           # W2 double-buffer
        b += 2 * 8 * th * 4 + 2 * 8 * d_out_p * 4   # b1 / b2 (sublane padded)
        b += 2 * tm_ * d_out_p * out_bytes          # output double-buffer
        if use_scratch:
            b += tm_ * d_out_p * 4                  # f32 accumulator
        return b

    while _budget(tm) > int(0.85 * vmem_limit) and tm > 64:
        tm = max(64, _round_up(tm // 2, 16))

    # ---- input prep (x only; weights were prepared once) ---------------------
    x2d = x.reshape(M, d_in).astype(compute_dtype)
    if (M_p != M) or (d_in_p != d_in):
        x2d = jnp.pad(x2d, ((0, M_p - M), (0, d_in_p - d_in)))

    gm = pl.cdiv(M_p, tm)
    compiler_params = pltpu.CompilerParams(
        dimension_semantics=("parallel",) if single_h else ("parallel", "arbitrary"),
        vmem_limit_bytes=vmem_limit,
    )

    if single_h:
        out2d = pl.pallas_call(
            _ffn_kernel_single,
            out_shape=jax.ShapeDtypeStruct((M_p, d_out_p), out_dtype),
            grid_spec=pltpu.PrefetchScalarGridSpec(
                num_scalar_prefetch=0,
                grid=(gm,),
                in_specs=[
                    pl.BlockSpec((tm, d_in_p), lambda i: (i, 0)),      # X row tile
                    pl.BlockSpec((d_in_p, H_p), lambda i: (0, 0)),     # W1 (full)
                    pl.BlockSpec((1, H_p), lambda i: (0, 0)),          # b1
                    pl.BlockSpec((H_p, d_out_p), lambda i: (0, 0)),    # W2 (full)
                    pl.BlockSpec((1, d_out_p), lambda i: (0, 0)),      # b2
                ],
                out_specs=pl.BlockSpec((tm, d_out_p), lambda i: (i, 0)),
            ),
            compiler_params=compiler_params,
        )(x2d, params.w1, params.b1, params.w2, params.b2)
    else:
        gh = H_p // th
        in_specs = [
            pl.BlockSpec((tm, d_in_p), lambda i, h: (i, 0)),       # X row tile
            pl.BlockSpec((d_in_p, th), lambda i, h: (0, h)),       # W1 hidden tile
            pl.BlockSpec((1, th), lambda i, h: (0, h)),            # b1 hidden tile
            pl.BlockSpec((th, d_out_p), lambda i, h: (h, 0)),      # W2 hidden tile
            pl.BlockSpec((1, d_out_p), lambda i, h: (0, 0)),       # b2 (constant)
        ]
        out_spec = pl.BlockSpec((tm, d_out_p), lambda i, h: (i, 0))
        if use_scratch:
            kernel = _ffn_kernel_htiled_acc
            scratch = [pltpu.VMEM((tm, d_out_p), jnp.float32)]
        else:
            kernel = _ffn_kernel_htiled_f32out      # accumulate into resident o_ref
            scratch = []
        out2d = pl.pallas_call(
            kernel,
            out_shape=jax.ShapeDtypeStruct((M_p, d_out_p), out_dtype),
            grid_spec=pltpu.PrefetchScalarGridSpec(
                num_scalar_prefetch=0,
                grid=(gm, gh),
                in_specs=in_specs,
                out_specs=out_spec,
                scratch_shapes=scratch,
            ),
            compiler_params=compiler_params,
        )(x2d, params.w1, params.b1, params.w2, params.b2)

    out = out2d
    if (M_p != M) or (d_out_p != d_out):
        out = out[:M, :d_out]
    return out.reshape(*lead, d_out)


def position_wise_ffn_raw(x, w1, b1, w2, b2, *, compute_dtype=jnp.bfloat16,
                          th=None, tm=None):
    """Convenience one-shot wrapper (prepares params per call)."""
    params = prepare_ffn_params(w1, b1, w2, b2, compute_dtype=compute_dtype, th=th)
    return position_wise_ffn(x, params, tm=tm)


# ----------------------------------------------------------------------------- demo / test

if __name__ == "__main__":
    key = jax.random.PRNGKey(0)

    def make_case(kseed, d_in, H, d_out):
        kx, k1, kb1, k2, kb2 = jax.random.split(kseed, 5)
        x = jax.random.normal(kx, (2, 8, d_in), dtype=jnp.float32)
        w1 = jax.random.normal(k1, (d_in, H), dtype=jnp.float32) / jnp.sqrt(d_in)
        b1 = jax.random.normal(kb1, (H,), dtype=jnp.float32) * 0.01
        w2 = jax.random.normal(k2, (H, d_out), dtype=jnp.float32) / jnp.sqrt(H)
        b2 = jax.random.normal(kb2, (d_out,), dtype=jnp.float32) * 0.01
        return x, w1, b1, w2, b2

    def check(out, x, w1, b1, w2, b2):
        bf = jnp.bfloat16
        # Reference 1: same bf16 operand rounding as the kernel, f32 accumulation.
        xq = x.astype(bf).astype(jnp.float32)
        w1q = w1.astype(bf).astype(jnp.float32)
        w2q = w2.astype(bf).astype(jnp.float32)
        h_ref = jnp.maximum(xq @ w1q + b1, 0.0).astype(bf).astype(jnp.float32)
        ref_bf16 = h_ref @ w2q + b2
        assert jnp.allclose(out, ref_bf16, atol=1e-2, rtol=1e-2), \
            "mismatch vs bf16-matched reference"
        # Reference 2: pure f32 module semantics (looser tol for bf16 rounding).
        ref_f32 = jnp.maximum(x @ w1 + b1, 0.0) @ w2 + b2
        assert jnp.allclose(out, ref_f32, atol=5e-2, rtol=5e-2), \
            "mismatch vs f32 reference"

    # Case 1: the module config (ffn_num_hiddens=64, ffn_num_outputs=32,
    # LazyLinear infers d_in=32) -> small-problem single-step fast path.
    k1_, k2_ = jax.random.split(key)
    x, w1, b1, w2, b2 = make_case(k1_, d_in=32, H=64, d_out=32)
    params = prepare_ffn_params(w1, b1, w2, b2)          # prepared ONCE, reusable
    out = jax.block_until_ready(position_wise_ffn(x, params))
    assert out.shape == (2, 8, 32)
    check(out, x, w1, b1, w2, b2)

    # Case 2: exercise the H-tiled reduction path (th=128 forces 2 hidden tiles,
    # f32 output -> accumulate directly into o_ref, no scratch).
    x2, w12, b12, w22, b22 = make_case(k2_, d_in=32, H=256, d_out=32)
    params2 = prepare_ffn_params(w12, b12, w22, b22, th=128)
    out2 = jax.block_until_ready(position_wise_ffn(x2, params2))
    assert out2.shape == (2, 8, 32)
    check(out2, x2, w12, b12, w22, b22)

    print("KERNEL_OK")
</pallas_src>

<mosaic_0001>
module attributes {stable_mosaic.version = 11 : i64} {
  func.func @_ffn_kernel_single(%arg0: i32, %arg1: memref<16x128xbf16, #tpu.memory_space<vmem>>, %arg2: memref<128x128xbf16, #tpu.memory_space<vmem>>, %arg3: memref<1x128xf32, #tpu.memory_space<vmem>>, %arg4: memref<128x128xbf16, #tpu.memory_space<vmem>>, %arg5: memref<1x128xf32, #tpu.memory_space<vmem>>, %arg6: memref<16x128xf32, #tpu.memory_space<vmem>>) attributes {dimension_semantics = [#tpu.dimension_semantics<parallel>], iteration_bounds = array<i64: 1>, scalar_prefetch = 0 : i64, scratch_operands = 0 : i64, tpu.core_type = #tpu.core_type<tc>, window_params = [{transform_indices = @transform_0, window_bounds = array<i64: 16, 128>}, {pipeline_mode = #tpu.pipeline_mode<synchronous>, transform_indices = @transform_1, window_bounds = array<i64: 128, 128>}, {pipeline_mode = #tpu.pipeline_mode<synchronous>, transform_indices = @transform_2, window_bounds = array<i64: 1, 128>}, {pipeline_mode = #tpu.pipeline_mode<synchronous>, transform_indices = @transform_3, window_bounds = array<i64: 128, 128>}, {pipeline_mode = #tpu.pipeline_mode<synchronous>, transform_indices = @transform_4, window_bounds = array<i64: 1, 128>}, {transform_indices = @transform_5, window_bounds = array<i64: 16, 128>}]} {
    %c0 = arith.constant 0 : index
    %c0_0 = arith.constant 0 : index
    %0 = vector.load %arg1[%c0, %c0_0] : memref<16x128xbf16, #tpu.memory_space<vmem>>, vector<16x128xbf16>
    %c0_1 = arith.constant 0 : index
    %c0_2 = arith.constant 0 : index
    %1 = vector.load %arg2[%c0_1, %c0_2] : memref<128x128xbf16, #tpu.memory_space<vmem>>, vector<128x128xbf16>
    %cst = arith.constant dense<0.000000e+00> : vector<16x128xf32>
    %2 = tpu.matmul %0, %1, %cst {dimension_numbers = #tpu.dot_dimension_numbers<[1], [0], [0], [1], [0, 0, 1, 1], [], []>} : vector<16x128xbf16>, vector<128x128xbf16>, vector<16x128xf32> -> vector<16x128xf32>
    %c0_3 = arith.constant 0 : index
    %c0_4 = arith.constant 0 : index
    %3 = vector.load %arg3[%c0_3, %c0_4] : memref<1x128xf32, #tpu.memory_space<vmem>>, vector<1x128xf32>
    %4 = vector.broadcast %3 : vector<1x128xf32> to vector<16x128xf32>
    %5 = arith.addf %2, %4 : vector<16x128xf32>
    %cst_5 = arith.constant 0.000000e+00 : f32
    %6 = vector.broadcast %cst_5 : f32 to vector<16x128xf32>
    %7 = arith.maximumf %5, %6 : vector<16x128xf32>
    %8 = arith.truncf %7 : vector<16x128xf32> to vector<16x128xbf16>
    %c0_6 = arith.constant 0 : index
    %c0_7 = arith.constant 0 : index
    %9 = vector.load %arg4[%c0_6, %c0_7] : memref<128x128xbf16, #tpu.memory_space<vmem>>, vector<128x128xbf16>
    %cst_8 = arith.constant dense<0.000000e+00> : vector<16x128xf32>
    %10 = tpu.matmul %8, %9, %cst_8 {dimension_numbers = #tpu.dot_dimension_numbers<[1], [0], [0], [1], [0, 0, 1, 1], [], []>} : vector<16x128xbf16>, vector<128x128xbf16>, vector<16x128xf32> -> vector<16x128xf32>
    %c0_9 = arith.constant 0 : index
    %c0_10 = arith.constant 0 : index
    %11 = vector.load %arg5[%c0_9, %c0_10] : memref<1x128xf32, #tpu.memory_space<vmem>>, vector<1x128xf32>
    %12 = vector.broadcast %11 : vector<1x128xf32> to vector<16x128xf32>
    %13 = arith.addf %10, %12 : vector<16x128xf32>
    %c0_11 = arith.constant 0 : index
    %c0_12 = arith.constant 0 : index
    %14 = vector.load %arg6[%c0_11, %c0_12] : memref<16x128xf32, #tpu.memory_space<vmem>>, vector<16x128xf32>
    tpu.vector_store %arg6[%c0_11, %c0_12], %13 {strides = array<i32>} : memref<16x128xf32, #tpu.memory_space<vmem>>, vector<16x128xf32>,
    return
  }
  func.func @transform_0(%arg0: i32) -> (i32, i32) {
    %c0_i32 = arith.constant 0 : i32
    %c0_i32_0 = arith.constant 0 : i32
    return %arg0, %c0_i32 : i32, i32
  }
  func.func @transform_1(%arg0: i32) -> (i32, i32) {
    %c0_i32 = arith.constant 0 : i32
    %c0_i32_0 = arith.constant 0 : i32
    %c0_i32_1 = arith.constant 0 : i32
    return %c0_i32, %c0_i32_0 : i32, i32
  }
  func.func @transform_2(%arg0: i32) -> (i32, i32) {
    %c0_i32 = arith.constant 0 : i32
    %c0_i32_0 = arith.constant 0 : i32
    %c0_i32_1 = arith.constant 0 : i32
    return %c0_i32, %c0_i32_0 : i32, i32
  }
  func.func @transform_3(%arg0: i32) -> (i32, i32) {
    %c0_i32 = arith.constant 0 : i32
    %c0_i32_0 = arith.constant 0 : i32
    %c0_i32_1 = arith.constant 0 : i32
    return %c0_i32, %c0_i32_0 : i32, i32
  }
  func.func @transform_4(%arg0: i32) -> (i32, i32) {
    %c0_i32 = arith.constant 0 : i32
    %c0_i32_0 = arith.constant 0 : i32
    %c0_i32_1 = arith.constant 0 : i32
    return %c0_i32, %c0_i32_0 : i32, i32
  }
  func.func @transform_5(%arg0: i32) -> (i32, i32) {
    %c0_i32 = arith.constant 0 : i32
    %c0_i32_0 = arith.constant 0 : i32
    return %arg0, %c0_i32 : i32, i32
  }
}

</mosaic_0001>

<bundles_post_ra>
// kernel: tpu_custom_call.1
= control target key start
LH: loop header
LB: loop body
LE: loop exit
PB: predicated region body
PF: predicated region fallthrough
CT: control target
= control target key end

     0   :  { %10 = vsyncpa [#allocation3], 0  ;;  %s518_s0 = inlined_call_operand.hbm [shape: bf16[16,128], index: 0, kind: input, shape index: {}]   ;;  %s519_s1 = inlined_call_operand.hbm [shape: bf16[128,128], index: 1, kind: input, shape index: {}]   ;;  %s520_s2 = inlined_call_operand.vmem [shape: f32[1,128], index: 2, kind: input, shape index: {}]   ;;  %s521_s3 = inlined_call_operand.hbm [shape: bf16[128,128], index: 3, kind: input, shape index: {}]   ;;  %s522_s4 = inlined_call_operand.vmem [shape: f32[1,128], index: 4, kind: input, shape index: {}]   ;;  %s523_s5 = inlined_call_operand.hbm [shape: f32[16,128], index: 5, kind: output, shape index: {}]  }
   0x1   :  { %11 = vsyncpa [#allocation6], 0 }
   0x2   :  { %12 = vsyncpa [#allocation4], 0  ;;  %s30_s20 = sshll.u32 %s519_s1, 4  ;;  %s462_s21 = smov [#allocation5]   ;;  %s31_s20 = int_to_ptr.hbm [resolvable:$true] %s30_s20 }
   0x3   :  { %s32_s22 = sshll.u32 %s462_s21, 4  ;;  %s17_s25 = sshll.u32 %s518_s0, 4  ;;  %s33_s22 = int_to_ptr.vmem [resolvable:$true] %s32_s22  ;;  %s18_s25 = int_to_ptr.hbm [resolvable:$true] %s17_s25 }
   0x4   :  { %s463_s26 = smov 64   ;;  %s464_s27 = smov 4  }
   0x5   :  { %38 = dma.hbm_to_vmem [thread:$0]  %s31_s20, 1024, %s33_s22, [#allocation6], %s463_s26, %s463_s26, %s464_s27  }
   0x6   :  { %s465_s28 = smov [#allocation2]   ;;  %s45_s7 = sshll.u32 %s521_s3, 4  ;;  %s46_s7 = int_to_ptr.hbm [resolvable:$true] %s45_s7 }
   0x7   :  { %s19_s29 = sshll.u32 %s465_s28, 4  ;;  %s466_s1 = smov [#allocation7]   ;;  %s20_s29 = int_to_ptr.vmem [resolvable:$true] %s19_s29 }
   0x8   :  { %25 = dma.hbm_to_vmem [thread:$0]  %s18_s25, 128, %s20_s29, [#allocation3], %s463_s26, %s463_s26, %s464_s27  }
   0x9   :  { %s47_s8 = sshll.u32 %s466_s1, 4  ;;  %s48_s8 = int_to_ptr.vmem [resolvable:$true] %s47_s8 }
   0xa   :  { %53 = dma.hbm_to_vmem [thread:$0]  %s46_s7, 1024, %s48_s8, [#allocation6], %s463_s26, %s463_s26, %s464_s27  }
   0xb   :  { %456 = dma.done.wait [#allocation3], 128  }
   0xc   :  { %457 = vsyncadd [#allocation3], 4294967168 }
   0xd   :  { %458 = dma.done.wait [#allocation6], 2048  }
   0xe   :  { %459 = vsyncadd [#allocation6], 4294965248  ;;  %v341_v0 = vld [vmem:[#allocation5 + $0x38] sm:$0xff]  ;;  %v340_v1 = vld [vmem:[#allocation5 + $0x30] sm:$0xff]  ;;  %s467_s11 = smov [#allocation8]   ;;  %s468_s15 = smov 128  }
   0xf   :  { %144 = vmatpush.bf16.msra.mxu0 %v341_v0  ;;  %v349_v2 = vld [vmem:[#allocation7 + $0x38] sm:$0xff]  ;;  %v348_v3 = vld [vmem:[#allocation7 + $0x30] sm:$0xff]  ;;  %v339_v4 = vld [vmem:[#allocation5 + $0x28] sm:$0xff]  ;;  %s249_s12 = sshll.u32 %s467_s11, 4  ;;  %s469_s16 = smov 8   ;;  %s250_s12 = int_to_ptr.vmem [resolvable:$true] %s249_s12 }
  0x10   :  { %229 = vmatpush.bf16.msra.mxu1 %v349_v2  ;;  %v347_v5 = vld [vmem:[#allocation7 + $0x28] sm:$0xff]  ;;  %v338_v6 = vld [vmem:[#allocation5 + $0x20] sm:$0xff]  ;;  %v337_v8 = vld [vmem:[#allocation5 + $0x18] sm:$0xff] }
  0x11   :  { %v346_v7 = vld [vmem:[#allocation7 + $0x20] sm:$0xff]  ;;  %v336_v9 = vld [vmem:[#allocation5 + $0x10] sm:$0xff]  ;;  %v335_v10 = vld [vmem:[#allocation5 + $0x8] sm:$0xff] }
  0x12   :  { %v334_v11 = vld [vmem:[#allocation5] sm:$0xff]  ;;  %v333_v12 = vld [vmem:[#allocation2] sm:$0xff]  ;;  %v344_v14 = vld [vmem:[#allocation7 + $0x10] sm:$0xff] }
  0x13   :  { %145 = vmatpush.bf16.msra.mxu0 %v340_v1  ;;  %v345_v13 = vld [vmem:[#allocation7 + $0x18] sm:$0xff]  ;;  %v343_v15 = vld [vmem:[#allocation7 + $0x8] sm:$0xff]  ;;  %v342_v16 = vld [vmem:[#allocation7] sm:$0xff] }
  0x14   :  { %230 = vmatpush.bf16.msra.mxu1 %v348_v3  ;;  %v358_v18 = vld [vmem:[%s520_s2] ss:$0 sm:$0xff]  ;;  %s251_s2 = sshll.u32 %s523_s5, 4  ;;  %s252_s2 = int_to_ptr.hbm [resolvable:$true] %s251_s2 }
  0x15   :  { %v359_v25 = vld [vmem:[%s522_s4] ss:$0 sm:$0xff] }
  0x17   :  { %146 = vmatpush.bf16.msra.mxu0 %v339_v4 }
  0x18   :  { %231 = vmatpush.bf16.msra.mxu1 %v347_v5 }
  0x1b   :  { %147 = vmatpush.bf16.msra.mxu0 %v338_v6 }
  0x1c   :  { %232 = vmatpush.bf16.msra.mxu1 %v346_v7 }
  0x1f   :  { %148 = vmatpush.bf16.msra.mxu0 %v337_v8 }
  0x20   :  { %233 = vmatpush.bf16.msra.mxu1 %v345_v13 }
  0x23   :  { %149 = vmatpush.bf16.msra.mxu0 %v336_v9 }
  0x24   :  { %234 = vmatpush.bf16.msra.mxu1 %v344_v14 }
  0x27   :  { %150 = vmatpush.bf16.msra.mxu0 %v335_v10 }
  0x28   :  { %235 = vmatpush.bf16.msra.mxu1 %v343_v15 }
  0x2b   :  { %151 = vmatpush.bf16.msra.mxu0 %v334_v11 }
  0x2c   :  { %236 = vmatpush.bf16.msra.mxu1 %v342_v16 }
  0x2e   :  { %152 = vmatmul.bf16.vlgmr.msra.gmra.mxu0 %v333_v12 }
  0xab   :  { %v153_v17 = vpop.f32.mrf.mxu0 }
  0xac   :  { %v154_v19 = vadd.f32 %v358_v18, %v153_v17 }
  0xae   :  { %v158_v22 = vmax.f32 %v154_v19, 0.0 }
  0xb3   :  { %v155_v20 = vpop.f32.mrf.mxu0 }
  0xb4   :  { %v156_v21 = vadd.f32 %v358_v18, %v155_v20 }
  0xb6   :  { %v159_v23 = vmax.f32 %v156_v21, 0.0 }
  0xb8   :  { %v160_v24 = vpack.c.bf16 %v159_v23, %v158_v22 }
  0xba   :  { %237 = vmatmul.bf16.vlgmr.msra.gmra.mxu1 %v160_v24 }
 0x137   :  { %v238_v26 = vpop.f32.mrf.mxu1 }
 0x138   :  { %v239_v27 = vadd.f32 %v359_v25, %v238_v26 }
 0x13a   :  { %243 = vst [vmem:[#allocation8] sm:$0xff] %v239_v27 }
 0x13f   :  { %v240_v28 = vpop.f32.mrf.mxu1 }
 0x140   :  { %v241_v29 = vadd.f32 %v359_v25, %v240_v28 }
 0x142   :  { %244 = vst [vmem:[#allocation8 + $0x8] sm:$0xff] %v241_v29 }
 0x143   :  { %257 = dma.vmem_to_hbm [thread:$0]  %s250_s12, 256, %s252_s2, [#allocation4], %s468_s15, %s468_s15, %s469_s16  }
 0x144   :  { %460 = dma.done.wait [#allocation4], 256  }
 0x145   :  { %461 = vsyncadd [#allocation4], 4294967040 }
 0x146   :  { %262 = vsyncpa [#allocation3], 1 }
 0x147   :  { %263 = vsyncpa [#allocation6], 1 }
 0x148   :  { %264 = vsyncpa [#allocation4], 1 }

</bundles_post_ra>
